<compile_context>
chip_gen: v7x
topology: tpu7x:2x2x1
jax: 0.10.0
libtpu: 0.0.40
codegen_flags: <defaults>
</compile_context>

<pallas_src>
import jax
import jax.numpy as jnp
from jax.experimental import pallas as pl
from jax.experimental.pallas import tpu as pltpu

_LANE = 128
_SUBLANE = 8


def _round_up(x, m):
    return (x + m - 1) // m * m


def mlp_policy_kernel(x_ref, w1_ref, b1_ref, w2_ref, b2_ref, w3_ref, b3_ref,
                      mean_ref):
    # bf16 operands into the MXU, f32 accumulation, f32 tanh (VPU/EUP path).
    x = x_ref[...].astype(jnp.bfloat16)
    h = jnp.tanh(
        jnp.dot(x, w1_ref[...], preferred_element_type=jnp.float32) + b1_ref[...]
    )
    h = jnp.tanh(
        jnp.dot(h.astype(jnp.bfloat16), w2_ref[...],
                preferred_element_type=jnp.float32) + b2_ref[...]
    )
    # Output head (identity activation), written un-padded (ac_dim lanes, f32).
    mean_ref[...] = (
        jnp.dot(h.astype(jnp.bfloat16), w3_ref[...],
                preferred_element_type=jnp.float32) + b3_ref[...]
    )


def mlp_policy_forward(obs, params, *, block_batch=2048, core_split=False):
    """Returns (batch_mean, scale_tril).

    batch_mean : (batch, ac_dim) f32  — mean of the MultivariateNormal.
    scale_tril : (ac_dim, ac_dim) f32 — unbatched lower-triangular scale; the torch
                 `.repeat(batch,1,1)` is a pure broadcast left to the consumer
                 (materializing it would only add redundant HBM traffic).
    """
    w1, b1, w2, b2, w3, b3, logstd = params
    batch, ob_dim = obs.shape
    size = w1.shape[1]
    ac_dim = w3.shape[1]

    # ---- Hidden width padded to full 128 lanes (weights are VMEM-resident, so the
    #      zero padding is HBM-free and mathematically inert: tanh(0)=0 feeds zero rows).
    size_p = _round_up(size, _LANE)
    pad_s = size_p - size
    w1p = jnp.pad(w1, ((0, 0), (0, pad_s))).astype(jnp.bfloat16)
    b1p = jnp.pad(b1, ((0, 0), (0, pad_s)))                       # f32
    w2p = jnp.pad(w2, ((0, pad_s), (0, pad_s))).astype(jnp.bfloat16)
    b2p = jnp.pad(b2, ((0, 0), (0, pad_s)))                       # f32
    w3p = jnp.pad(w3, ((0, pad_s), (0, 0))).astype(jnp.bfloat16)  # head NOT lane-padded
    b3p = b3                                                      # (1, ac_dim) f32

    # ---- Batch tiling: no host-side pad / slice. Ragged last block is safe because
    #      rows are independent and out-of-bounds output rows are never written back.
    if batch <= block_batch:
        tb = batch                      # single exact block (block == full dim is legal)
    else:
        tb = block_batch
        assert tb % _SUBLANE == 0, "block_batch must be a multiple of 8"
    grid = (pl.cdiv(batch, tb),)

    const = lambda i: (0, 0)            # weights/biases: same block every step -> VMEM-resident
    sem = (pltpu.CORE_PARALLEL,) if core_split else ("parallel",)

    cost = pl.CostEstimate(
        flops=2 * batch * (ob_dim * size_p + size_p * size_p + size_p * ac_dim),
        transcendentals=2 * batch * size_p,
        bytes_accessed=(obs.dtype.itemsize * batch * ob_dim
                        + 2 * (ob_dim * size_p + size_p * size_p + size_p * ac_dim)
                        + 4 * (2 * size_p + ac_dim)
                        + 4 * batch * ac_dim),
    )

    batch_mean = pl.pallas_call(
        mlp_policy_kernel,
        out_shape=jax.ShapeDtypeStruct((batch, ac_dim), jnp.float32),
        grid=grid,
        in_specs=[
            pl.BlockSpec((tb, ob_dim), lambda i: (i, 0)),   # obs, tiled over batch
            pl.BlockSpec((ob_dim, size_p), const),          # W1 (bf16)
            pl.BlockSpec((1, size_p), const),               # b1 (f32)
            pl.BlockSpec((size_p, size_p), const),          # W2 (bf16)
            pl.BlockSpec((1, size_p), const),               # b2 (f32)
            pl.BlockSpec((size_p, ac_dim), const),          # W3 (bf16, un-padded head)
            pl.BlockSpec((1, ac_dim), const),               # b3 (f32)
        ],
        out_specs=pl.BlockSpec((tb, ac_dim), lambda i: (i, 0)),
        compiler_params=pltpu.CompilerParams(dimension_semantics=sem),
        cost_estimate=cost,
    )(obs, w1p, b1p, w2p, b2p, w3p, b3p)

    # scale_tril: batch-independent and tiny -> plain JAX, unbatched.
    std = jnp.exp(jnp.clip(logstd, -10.0, 2.0))
    scale_tril = jnp.diag(std)
    return batch_mean, scale_tril


def init_params(key, ob_dim, ac_dim, size):
    """Deterministic parameter init for a 2-hidden-layer MLP (n_layers=2)."""
    ks = jax.random.split(key, 6)
    scale = 0.1
    w1 = scale * jax.random.normal(ks[0], (ob_dim, size), jnp.float32)
    b1 = scale * jax.random.normal(ks[1], (1, size), jnp.float32)
    w2 = scale * jax.random.normal(ks[2], (size, size), jnp.float32)
    b2 = scale * jax.random.normal(ks[3], (1, size), jnp.float32)
    w3 = scale * jax.random.normal(ks[4], (size, ac_dim), jnp.float32)
    b3 = scale * jax.random.normal(ks[5], (1, ac_dim), jnp.float32)
    logstd = jnp.zeros((ac_dim,), jnp.float32)   # nn.Parameter(torch.zeros(ac_dim))
    return (w1, b1, w2, b2, w3, b3, logstd)


if __name__ == "__main__":
    # Small shapes implied by the module: obs (batch, ob_dim), hidden `size`, output ac_dim.
    batch, ob_dim, ac_dim, size = 8, 16, 4, 32
    key = jax.random.PRNGKey(0)
    k_obs, k_params = jax.random.split(key)

    obs = jax.random.normal(k_obs, (batch, ob_dim), jnp.float32)
    params = init_params(k_params, ob_dim, ac_dim, size)

    batch_mean, scale_tril = mlp_policy_forward(obs, params)
    jax.block_until_ready((batch_mean, scale_tril))

    # Lightweight sanity check against an f32 plain-JAX reference.
    w1, b1, w2, b2, w3, b3, logstd = params
    h = jnp.tanh(obs @ w1 + b1)
    h = jnp.tanh(h @ w2 + b2)
    ref_mean = h @ w3 + b3
    ref_tril = jnp.diag(jnp.exp(jnp.clip(logstd, -10.0, 2.0)))

    # Consumer-side broadcast stands in for torch's scale_tril.repeat(batch, 1, 1).
    batch_scale_tril = jnp.broadcast_to(scale_tril[None], (batch, ac_dim, ac_dim))

    assert batch_mean.shape == (batch, ac_dim)
    assert scale_tril.shape == (ac_dim, ac_dim)
    assert batch_scale_tril.shape == (batch, ac_dim, ac_dim)
    # bf16 MXU operands -> relaxed tolerance on the mean.
    assert jnp.allclose(batch_mean, ref_mean, atol=2e-2, rtol=2e-2)
    assert jnp.allclose(scale_tril, ref_tril, atol=1e-6)

    # TODO(synk): MultivariateNormal object construction / sampling is left to the
    # consumer; the kernel returns its parameters (mean, scale_tril).
    print("KERNEL_OK")
</pallas_src>

<mosaic_0001>
module attributes {stable_mosaic.version = 11 : i64} {
  func.func @mlp_policy_kernel(%arg0: i32, %arg1: memref<8x16xf32, #tpu.memory_space<vmem>>, %arg2: memref<16x128xbf16, #tpu.memory_space<vmem>>, %arg3: memref<1x128xf32, #tpu.memory_space<vmem>>, %arg4: memref<128x128xbf16, #tpu.memory_space<vmem>>, %arg5: memref<1x128xf32, #tpu.memory_space<vmem>>, %arg6: memref<128x4xbf16, #tpu.memory_space<vmem>>, %arg7: memref<1x4xf32, #tpu.memory_space<vmem>>, %arg8: memref<8x4xf32, #tpu.memory_space<vmem>>) attributes {dimension_semantics = [#tpu.dimension_semantics<parallel>], iteration_bounds = array<i64: 1>, scalar_prefetch = 0 : i64, scratch_operands = 0 : i64, tpu.core_type = #tpu.core_type<tc>, window_params = [{transform_indices = @transform_0, window_bounds = array<i64: 8, 16>}, {pipeline_mode = #tpu.pipeline_mode<synchronous>, transform_indices = @transform_1, window_bounds = array<i64: 16, 128>}, {pipeline_mode = #tpu.pipeline_mode<synchronous>, transform_indices = @transform_2, window_bounds = array<i64: 1, 128>}, {pipeline_mode = #tpu.pipeline_mode<synchronous>, transform_indices = @transform_3, window_bounds = array<i64: 128, 128>}, {pipeline_mode = #tpu.pipeline_mode<synchronous>, transform_indices = @transform_4, window_bounds = array<i64: 1, 128>}, {pipeline_mode = #tpu.pipeline_mode<synchronous>, transform_indices = @transform_5, window_bounds = array<i64: 128, 4>}, {pipeline_mode = #tpu.pipeline_mode<synchronous>, transform_indices = @transform_6, window_bounds = array<i64: 1, 4>}, {transform_indices = @transform_7, window_bounds = array<i64: 8, 4>}]} {
    %c0 = arith.constant 0 : index
    %c0_0 = arith.constant 0 : index
    %0 = vector.load %arg1[%c0, %c0_0] : memref<8x16xf32, #tpu.memory_space<vmem>>, vector<8x16xf32>
    %1 = arith.truncf %0 : vector<8x16xf32> to vector<8x16xbf16>
    %c0_1 = arith.constant 0 : index
    %c0_2 = arith.constant 0 : index
    %2 = vector.load %arg2[%c0_1, %c0_2] : memref<16x128xbf16, #tpu.memory_space<vmem>>, vector<16x128xbf16>
    %cst = arith.constant dense<0.000000e+00> : vector<8x128xf32>
    %3 = tpu.matmul %1, %2, %cst {dimension_numbers = #tpu.dot_dimension_numbers<[1], [0], [0], [1], [0, 0, 1, 1], [], []>} : vector<8x16xbf16>, vector<16x128xbf16>, vector<8x128xf32> -> vector<8x128xf32>
    %c0_3 = arith.constant 0 : index
    %c0_4 = arith.constant 0 : index
    %4 = vector.load %arg3[%c0_3, %c0_4] : memref<1x128xf32, #tpu.memory_space<vmem>>, vector<1x128xf32>
    %5 = vector.broadcast %4 : vector<1x128xf32> to vector<8x128xf32>
    %6 = arith.addf %3, %5 : vector<8x128xf32>
    %7 = math.tanh %6 : vector<8x128xf32>
    %8 = arith.truncf %7 : vector<8x128xf32> to vector<8x128xbf16>
    %c0_5 = arith.constant 0 : index
    %c0_6 = arith.constant 0 : index
    %9 = vector.load %arg4[%c0_5, %c0_6] : memref<128x128xbf16, #tpu.memory_space<vmem>>, vector<128x128xbf16>
    %cst_7 = arith.constant dense<0.000000e+00> : vector<8x128xf32>
    %10 = tpu.matmul %8, %9, %cst_7 {dimension_numbers = #tpu.dot_dimension_numbers<[1], [0], [0], [1], [0, 0, 1, 1], [], []>} : vector<8x128xbf16>, vector<128x128xbf16>, vector<8x128xf32> -> vector<8x128xf32>
    %c0_8 = arith.constant 0 : index
    %c0_9 = arith.constant 0 : index
    %11 = vector.load %arg5[%c0_8, %c0_9] : memref<1x128xf32, #tpu.memory_space<vmem>>, vector<1x128xf32>
    %12 = vector.broadcast %11 : vector<1x128xf32> to vector<8x128xf32>
    %13 = arith.addf %10, %12 : vector<8x128xf32>
    %14 = math.tanh %13 : vector<8x128xf32>
    %15 = arith.truncf %14 : vector<8x128xf32> to vector<8x128xbf16>
    %c0_10 = arith.constant 0 : index
    %c0_11 = arith.constant 0 : index
    %16 = vector.load %arg6[%c0_10, %c0_11] : memref<128x4xbf16, #tpu.memory_space<vmem>>, vector<128x4xbf16>
    %cst_12 = arith.constant dense<0.000000e+00> : vector<8x4xf32>
    %17 = tpu.matmul %15, %16, %cst_12 {dimension_numbers = #tpu.dot_dimension_numbers<[1], [0], [0], [1], [0, 0, 1, 1], [], []>} : vector<8x128xbf16>, vector<128x4xbf16>, vector<8x4xf32> -> vector<8x4xf32>
    %c0_13 = arith.constant 0 : index
    %c0_14 = arith.constant 0 : index
    %18 = vector.load %arg7[%c0_13, %c0_14] : memref<1x4xf32, #tpu.memory_space<vmem>>, vector<1x4xf32>
    %19 = vector.broadcast %18 : vector<1x4xf32> to vector<8x4xf32>
    %20 = arith.addf %17, %19 : vector<8x4xf32>
    %c0_15 = arith.constant 0 : index
    %c0_16 = arith.constant 0 : index
    %21 = vector.load %arg8[%c0_15, %c0_16] : memref<8x4xf32, #tpu.memory_space<vmem>>, vector<8x4xf32>
    tpu.vector_store %arg8[%c0_15, %c0_16], %20 {strides = array<i32>} : memref<8x4xf32, #tpu.memory_space<vmem>>, vector<8x4xf32>,
    return
  }
  func.func @transform_0(%arg0: i32) -> (i32, i32) {
    %c0_i32 = arith.constant 0 : i32
    %c0_i32_0 = arith.constant 0 : i32
    return %arg0, %c0_i32 : i32, i32
  }
  func.func @transform_1(%arg0: i32) -> (i32, i32) {
    %c0_i32 = arith.constant 0 : i32
    %c0_i32_0 = arith.constant 0 : i32
    %c0_i32_1 = arith.constant 0 : i32
    return %c0_i32, %c0_i32_0 : i32, i32
  }
  func.func @transform_2(%arg0: i32) -> (i32, i32) {
    %c0_i32 = arith.constant 0 : i32
    %c0_i32_0 = arith.constant 0 : i32
    %c0_i32_1 = arith.constant 0 : i32
    return %c0_i32, %c0_i32_0 : i32, i32
  }
  func.func @transform_3(%arg0: i32) -> (i32, i32) {
    %c0_i32 = arith.constant 0 : i32
    %c0_i32_0 = arith.constant 0 : i32
    %c0_i32_1 = arith.constant 0 : i32
    return %c0_i32, %c0_i32_0 : i32, i32
  }
  func.func @transform_4(%arg0: i32) -> (i32, i32) {
    %c0_i32 = arith.constant 0 : i32
    %c0_i32_0 = arith.constant 0 : i32
    %c0_i32_1 = arith.constant 0 : i32
    return %c0_i32, %c0_i32_0 : i32, i32
  }
  func.func @transform_5(%arg0: i32) -> (i32, i32) {
    %c0_i32 = arith.constant 0 : i32
    %c0_i32_0 = arith.constant 0 : i32
    %c0_i32_1 = arith.constant 0 : i32
    return %c0_i32, %c0_i32_0 : i32, i32
  }
  func.func @transform_6(%arg0: i32) -> (i32, i32) {
    %c0_i32 = arith.constant 0 : i32
    %c0_i32_0 = arith.constant 0 : i32
    %c0_i32_1 = arith.constant 0 : i32
    return %c0_i32, %c0_i32_0 : i32, i32
  }
  func.func @transform_7(%arg0: i32) -> (i32, i32) {
    %c0_i32 = arith.constant 0 : i32
    %c0_i32_0 = arith.constant 0 : i32
    return %arg0, %c0_i32 : i32, i32
  }
}

</mosaic_0001>

<bundles_post_ra>
// kernel: tpu_custom_call.1
= control target key start
LH: loop header
LB: loop body
LE: loop exit
PB: predicated region body
PF: predicated region fallthrough
CT: control target
= control target key end

     0   :  { %12 = vsyncpa [#allocation3], 0  ;;  %s472_s24 = smov [#allocation2]   ;;  %s615_s0 = inlined_call_operand.vmem [shape: f32[8,16], index: 0, kind: input, shape index: {}]   ;;  %s616_s1 = inlined_call_operand.hbm [shape: bf16[16,128], index: 1, kind: input, shape index: {}]   ;;  %s617_s2 = inlined_call_operand.vmem [shape: f32[1,128], index: 2, kind: input, shape index: {}]   ;;  %s618_s3 = inlined_call_operand.vmem [shape: bf16[128,128], index: 3, kind: input, shape index: {}]   ;;  %s619_s4 = inlined_call_operand.vmem [shape: f32[1,128], index: 4, kind: input, shape index: {}]   ;;  %s620_s5 = inlined_call_operand.vmem [shape: bf16[128,4], index: 5, kind: input, shape index: {}]   ;;  %s621_s6 = inlined_call_operand.vmem [shape: f32[1,4], index: 6, kind: input, shape index: {}]   ;;  %s622_s7 = inlined_call_operand.vmem [shape: f32[8,4], index: 7, kind: output, shape index: {}]  }
   0x1   :  { %s20_s25 = sshll.u32 %s472_s24, 4  ;;  %s448_s28 = scalar_lea.hbm %s616_s1, 128  ;;  %s21_s25 = int_to_ptr.vmem [resolvable:$true] %s20_s25 }
   0x2   :  { %p449_p0 = scmp.ne.s32.totalorder %s616_s1, %s448_s28  ;;  %p452_p1 = scmp.lt.u32.totalorder %s448_s28, %s616_s1 }
   0x4   :  { %p454_p2 = pnand %p452_p1, %p449_p0 }
   0x6   :  { %457 = shalt.err (!%p454_p2)
}
   0x7   :  { %s458_s10 = scalar_lea.vmem %s21_s25, 128  ;;  %p463_p4 = scmp.lt.s32.totalorder %s21_s25, %s21_s25 }
   0x8   :  { %p459_p3 = scmp.ne.s32.totalorder %s21_s25, %s458_s10  ;;  %p464_p5 = scmp.lt.s32.totalorder %s458_s10, %s458_s10 }
   0xa   :  { %p465_p6 = por %p464_p5, %p463_p4 }
   0xc   :  { %p466_p7 = pnand %p465_p6, %p459_p3 }
   0xe   :  { %469 = shalt.err (!%p466_p7)
}
   0xf   :  { %s473_s11 = smov 64   ;;  %s474_s12 = smov 4  }
  0x10   :  { %26 = dma.hbm_to_vmem [thread:$0]  %s616_s1, 128, %s21_s25, [#allocation3], %s473_s11, %s473_s11, %s474_s12  }
  0x11   :  { %470 = dma.done.wait [#allocation3], 128  }
  0x12   :  { %471 = vsyncadd [#allocation3], 4294967168  ;;  %v475_v0 = vmov 0.0   ;;  %vm476_vm0 = vmmov 0   ;;  %v427_v1 = vld [vmem:[#allocation2] sm:$0xff]   ;;  %vm58_vm1 = vcmask 130048  }
  0x13   :  { %376 = vmatprep.subr.bf16.mxu0 %v475_v0  ;;  %378 = vmatprep.mubr.msk.bf16.mxu0 %vm476_vm0, %v475_v0  ;;  %v41_v2 = vld [vmem:[%s615_s0] sm:$0xff]  ;;  %v429_v5 = vld [vmem:[%s618_s3 + $0x8] sm:$0xff]   ;;  %v430_v6 = vld [vmem:[%s618_s3 + $0x10] sm:$0xff]   ;;  %vm328_vm2 = vcmask 31744  }
  0x14   :  { %382 = vmatprep.subr.bf16.mxu1 %v475_v0  ;;  %398 = vmatprep.mubr.msk.bf16.mxu1 %vm476_vm0, %v475_v0  ;;  %v42_v3 = vpack.c.bf16 %v41_v2, %v41_v2  ;;  %v428_v4 = vld [vmem:[%s618_s3] sm:$0xff]   ;;  %v431_v7 = vld [vmem:[%s618_s3 + $0x18] sm:$0xff]   ;;  %v433_v9 = vld [vmem:[%s618_s3 + $0x28] sm:$0xff]  }
  0x15   :  { %377 = vmatpush3.bf16.msra.mxu0 %v427_v1  ;;  %383 = vmatpush3.bf16.msra.mxu1 %v428_v4  ;;  %v432_v8 = vld [vmem:[%s618_s3 + $0x20] sm:$0xff]   ;;  %v434_v10 = vld [vmem:[%s618_s3 + $0x30] sm:$0xff]   ;;  %v435_v11 = vld [vmem:[%s618_s3 + $0x38] sm:$0xff]  }
  0x16   :  { %402 = vmatprep.subr.bf16.mxu0 %v475_v0  ;;  %384 = vmatprep.subr.bf16.mxu1 %v475_v0  ;;  %v436_v12 = vld [vmem:[%s620_s5] sm:$0xff]   ;;  %v437_v13 = vld [vmem:[%s620_s5 + $0x8] sm:$0xff]   ;;  %v438_v14 = vld [vmem:[%s620_s5 + $0x10] sm:$0xff]  }
  0x17   :  { %v439_v15 = vld [vmem:[%s620_s5 + $0x18] sm:$0xff]   ;;  %v335_v16 = vld [vmem:[%s617_s2] ss:$0 sm:$0xff]  ;;  %v441_v25 = vld [vmem:[%s620_s5 + $0x28] sm:$0xff]  }
  0x18   :  { %379 = vmatmul.mubr.msk.bf16.vlgmr.msra.gmra.mrb[0].mxu0 %vm58_vm1, %v42_v3  ;;  %v440_v24 = vld [vmem:[%s620_s5 + $0x20] sm:$0xff]   ;;  %v442_v26 = vld [vmem:[%s620_s5 + $0x30] sm:$0xff]   ;;  %v443_v27 = vld [vmem:[%s620_s5 + $0x38] sm:$0xff]  }
  0x19   :  { %418 = vmatprep.mubr.msk.bf16.mxu0 %vm476_vm0, %v475_v0  ;;  %385 = vmatpush3.bf16.msra.mxu1 %v429_v5  ;;  %v338_v28 = vld [vmem:[%s619_s4] ss:$0 sm:$0xff] }
  0x1a   :  { %386 = vmatprep.subr.bf16.mxu1 %v475_v0  ;;  %403 = vmatpush3.bf16.msra.mxu0 %v436_v12  ;;  %v347_v36 = vld [vmem:[%s621_s6] ss:$0 sm:$0xff] }
  0x1b   :  { %404 = vmatprep.subr.bf16.mxu0 %v475_v0 }
  0x1d   :  { %387 = vmatpush3.bf16.msra.mxu1 %v430_v6 }
  0x1e   :  { %388 = vmatprep.subr.bf16.mxu1 %v475_v0  ;;  %405 = vmatpush3.bf16.msra.mxu0 %v437_v13 }
  0x1f   :  { %406 = vmatprep.subr.bf16.mxu0 %v475_v0 }
  0x21   :  { %389 = vmatpush3.bf16.msra.mxu1 %v431_v7 }
  0x22   :  { %390 = vmatprep.subr.bf16.mxu1 %v475_v0  ;;  %407 = vmatpush3.bf16.msra.mxu0 %v438_v14 }
  0x23   :  { %408 = vmatprep.subr.bf16.mxu0 %v475_v0 }
  0x25   :  { %391 = vmatpush3.bf16.msra.mxu1 %v432_v8 }
  0x26   :  { %392 = vmatprep.subr.bf16.mxu1 %v475_v0  ;;  %409 = vmatpush3.bf16.msra.mxu0 %v439_v15 }
  0x27   :  { %410 = vmatprep.subr.bf16.mxu0 %v475_v0 }
  0x29   :  { %393 = vmatpush3.bf16.msra.mxu1 %v433_v9 }
  0x2a   :  { %394 = vmatprep.subr.bf16.mxu1 %v475_v0  ;;  %411 = vmatpush3.bf16.msra.mxu0 %v440_v24 }
  0x2b   :  { %412 = vmatprep.subr.bf16.mxu0 %v475_v0 }
  0x2d   :  { %395 = vmatpush3.bf16.msra.mxu1 %v434_v10 }
  0x2e   :  { %396 = vmatprep.subr.bf16.mxu1 %v475_v0  ;;  %413 = vmatpush3.bf16.msra.mxu0 %v441_v25 }
  0x2f   :  { %414 = vmatprep.subr.bf16.mxu0 %v475_v0 }
  0x31   :  { %397 = vmatpush3.bf16.msra.mxu1 %v435_v11 }
  0x32   :  { %415 = vmatpush3.bf16.msra.mxu0 %v442_v26 }
  0x33   :  { %416 = vmatprep.subr.bf16.mxu0 %v475_v0 }
  0x36   :  { %417 = vmatpush3.bf16.msra.mxu0 %v443_v27 }
  0xeb   :  { %v96_v17 = vpop.f32.mrb[0].mxu0 }
  0xec   :  { %v97_v18 = vadd.f32 %v335_v16, %v96_v17  ;;  %v380_v19 = vpop.f32.mrb[1].mxu0 }
  0xed   :  { %v99_v20 = vpop.f32.mrb[2].mxu0 }
  0xee   :  { %444 = vtanh.f32 %v97_v18  ;;  %v381_v21 = vpop.f32.mrb[3].mxu0 }
  0xf8   :  { %v445_v22 = vpop.eup %444 }
  0xf9   :  { %v103_v23 = vpack.c.bf16 %v445_v22, %v445_v22 }
  0xfb   :  { %399 = vmatmul.mubr.bf16.vlgmr.msra.gmra.mrb[0].mxu1 %v103_v23 }
 0x1ce   :  { %v209_v29 = vpop.f32.mrb[0].mxu1 }
 0x1cf   :  { %v210_v30 = vadd.f32 %v338_v28, %v209_v29  ;;  %v400_v31 = vpop.f32.mrb[1].mxu1 }
 0x1d0   :  { %v212_v32 = vpop.f32.mrb[2].mxu1 }
 0x1d1   :  { %446 = vtanh.f32 %v210_v30  ;;  %v401_v33 = vpop.f32.mrb[3].mxu1 }
 0x1db   :  { %v447_v34 = vpop.eup %446 }
 0x1dc   :  { %v216_v35 = vpack.c.bf16 %v447_v34, %v447_v34 }
 0x1de   :  { %419 = vmatmul.mubr.bf16.vlgmr.msra.gmra.mrb[4].mxu0 %v216_v35 }
 0x2b1   :  { %v322_v37 = vpop.f32.mrb[4].mxu0 }
 0x2b2   :  { %v323_v38 = vadd.f32 %v347_v36, %v322_v37  ;;  %v420_v39 = vpop.f32.mrb[5].mxu0 }
 0x2b3   :  { %v325_v40 = vpop.f32.mrb[6].mxu0 }
 0x2b4   :  { %329 = vst.msk [vmem:[%s622_s7] sm:$0xff] %vm328_vm2, %v323_v38  ;;  %v421_v41 = vpop.f32.mrb[7].mxu0 }
 0x2b5   :  { %334 = vsyncpa [#allocation3], 1 }

</bundles_post_ra>
